<compile_context>
chip_gen: v6e
topology: v6e:2x2x1
jax: 0.10.0
libtpu: 0.0.40
codegen_flags: <defaults>
</compile_context>

<pallas_src>
import jax
import jax.numpy as jnp
from jax import lax
from jax.experimental import pallas as pl
from jax.experimental.pallas import tpu as pltpu


def triu_kernel(w_ref, x_ref, b_ref, o_ref):
    """w_ref: (T, T) pre-masked tril weights (resident across grid steps)
       x_ref: (T, TN) input slab, rows of (B*C) on the lane axis
       b_ref: (T, 1)  bias column
       o_ref: (T, TN) output slab (out^T)"""
    out = lax.dot_general(
        w_ref[...], x_ref[...],
        dimension_numbers=(((1,), (0,)), ((), ())),   # plain (T,T)@(T,TN)
        preferred_element_type=jnp.float32,
    )
    o_ref[...] = (out + b_ref[...]).astype(o_ref.dtype)


def triu_forward(x, w, b, *, lane_tile=512):
    """x: (B, C, T); w: (T, T) packed per-timestep weights; b: (T,) bias."""
    B, C, T = x.shape
    M = B * C

    # Constant preprocessing, amortized once in XLA (not per grid step).
    wm = jnp.tril(w).astype(x.dtype)           # causal mask applied once
    bc = b.reshape(T, 1).astype(jnp.float32)   # bias as a column
    xt = x.reshape(M, T).T                     # (T, M): M on the lane axis

    # Lane-axis tiling: multiple of 128, padded so no rows are dropped.
    TN = min(lane_tile, int(pl.cdiv(M, 128)) * 128)
    M_pad = int(pl.cdiv(M, TN)) * TN
    if M_pad != M:
        xt = jnp.pad(xt, ((0, 0), (0, M_pad - M)))
    grid = (M_pad // TN,)

    # VMEM budget: resident W + bias, double-buffered x/out tiles (+ slack).
    vmem_bytes = 4 * (T * T + T) + 4 * (2 * 2 * T * TN) + (1 << 20)
    vmem_bytes = min(max(vmem_bytes, 4 << 20), 48 << 20)

    cost = pl.CostEstimate(
        flops=2 * M * T * T,
        transcendentals=0,
        bytes_accessed=4 * (2 * M * T + T * T + T),
    )

    out_t = pl.pallas_call(
        triu_kernel,
        out_shape=jax.ShapeDtypeStruct((T, M_pad), x.dtype),
        grid_spec=pltpu.PrefetchScalarGridSpec(
            num_scalar_prefetch=0,
            grid=grid,
            in_specs=[
                pl.BlockSpec((T, T), lambda i: (0, 0)),    # W: resident
                pl.BlockSpec((T, TN), lambda i: (0, i)),   # x^T lane tile
                pl.BlockSpec((T, 1), lambda i: (0, 0)),    # bias: resident
            ],
            out_specs=pl.BlockSpec((T, TN), lambda i: (0, i)),
        ),
        compiler_params=pltpu.CompilerParams(
            dimension_semantics=("parallel",),
            vmem_limit_bytes=vmem_bytes,
        ),
        cost_estimate=cost,
    )(wm, xt, bc)

    # TODO(synk): for very large T (>~512) the (T,T) weight block should also
    # be tiled along the contraction axis; the module implies small time_step.
    return out_t[:, :M].T.reshape(B, C, T)


def triu_ref(x, w, b):
    """Pure-JAX reference matching the PyTorch loop exactly."""
    T = x.shape[-1]
    wm = jnp.tril(w.astype(jnp.float32))
    return (jnp.einsum("bct,it->bci", x.astype(jnp.float32), wm) + b).astype(x.dtype)


if __name__ == "__main__":
    key = jax.random.PRNGKey(0)
    B, C, T = 2, 4, 8  # time_step = 8

    k_x, k_w, k_b = jax.random.split(key, 3)
    x = jax.random.normal(k_x, (B, C, T), dtype=jnp.float32)

    # Packed parameters: row i holds the weights of Linear(i+1, 1)
    # (only the first i+1 entries are used; the wrapper masks the rest).
    w = jax.random.normal(k_w, (T, T), dtype=jnp.float32) * 0.1
    b = jax.random.normal(k_b, (T,), dtype=jnp.float32) * 0.1

    out = triu_forward(x, w, b)
    out = jax.block_until_ready(out)

    ref = triu_ref(x, w, b)
    assert out.shape == (B, C, T), out.shape
    assert jnp.allclose(out, ref, atol=1e-5, rtol=1e-5), (
        "mismatch vs reference: max abs diff "
        f"{float(jnp.max(jnp.abs(out - ref)))}"
    )
    print("KERNEL_OK")
</pallas_src>

<mosaic_0001>
module attributes {stable_mosaic.version = 11 : i64} {
  func.func @triu_kernel(%arg0: i32, %arg1: memref<8x8xf32, #tpu.memory_space<vmem>>, %arg2: memref<8x128xf32, #tpu.memory_space<vmem>>, %arg3: memref<8x1xf32, #tpu.memory_space<vmem>>, %arg4: memref<8x128xf32, #tpu.memory_space<vmem>>) attributes {dimension_semantics = [#tpu.dimension_semantics<parallel>], iteration_bounds = array<i64: 1>, scalar_prefetch = 0 : i64, scratch_operands = 0 : i64, tpu.core_type = #tpu.core_type<tc>, window_params = [{pipeline_mode = #tpu.pipeline_mode<synchronous>, transform_indices = @transform_0, window_bounds = array<i64: 8, 8>}, {transform_indices = @transform_1, window_bounds = array<i64: 8, 128>}, {pipeline_mode = #tpu.pipeline_mode<synchronous>, transform_indices = @transform_2, window_bounds = array<i64: 8, 1>}, {transform_indices = @transform_3, window_bounds = array<i64: 8, 128>}]} {
    %c0 = arith.constant 0 : index
    %c0_0 = arith.constant 0 : index
    %0 = vector.load %arg1[%c0, %c0_0] : memref<8x8xf32, #tpu.memory_space<vmem>>, vector<8x8xf32>
    %c0_1 = arith.constant 0 : index
    %c0_2 = arith.constant 0 : index
    %1 = vector.load %arg2[%c0_1, %c0_2] : memref<8x128xf32, #tpu.memory_space<vmem>>, vector<8x128xf32>
    %cst = arith.constant dense<0.000000e+00> : vector<8x128xf32>
    %2 = tpu.matmul %0, %1, %cst {dimension_numbers = #tpu.dot_dimension_numbers<[1], [0], [0], [1], [0, 0, 1, 1], [], []>} : vector<8x8xf32>, vector<8x128xf32>, vector<8x128xf32> -> vector<8x128xf32>
    %c0_3 = arith.constant 0 : index
    %c0_4 = arith.constant 0 : index
    %3 = vector.load %arg3[%c0_3, %c0_4] : memref<8x1xf32, #tpu.memory_space<vmem>>, vector<8x1xf32>
    %4 = vector.broadcast %3 : vector<8x1xf32> to vector<8x128xf32>
    %5 = arith.addf %2, %4 : vector<8x128xf32>
    %c0_5 = arith.constant 0 : index
    %c0_6 = arith.constant 0 : index
    %6 = vector.load %arg4[%c0_5, %c0_6] : memref<8x128xf32, #tpu.memory_space<vmem>>, vector<8x128xf32>
    tpu.vector_store %arg4[%c0_5, %c0_6], %5 {strides = array<i32>} : memref<8x128xf32, #tpu.memory_space<vmem>>, vector<8x128xf32>,
    return
  }
  func.func @transform_0(%arg0: i32) -> (i32, i32) {
    %c0_i32 = arith.constant 0 : i32
    %c0_i32_0 = arith.constant 0 : i32
    %c0_i32_1 = arith.constant 0 : i32
    return %c0_i32, %c0_i32_0 : i32, i32
  }
  func.func @transform_1(%arg0: i32) -> (i32, i32) {
    %c0_i32 = arith.constant 0 : i32
    %c0_i32_0 = arith.constant 0 : i32
    return %c0_i32, %arg0 : i32, i32
  }
  func.func @transform_2(%arg0: i32) -> (i32, i32) {
    %c0_i32 = arith.constant 0 : i32
    %c0_i32_0 = arith.constant 0 : i32
    %c0_i32_1 = arith.constant 0 : i32
    return %c0_i32, %c0_i32_0 : i32, i32
  }
  func.func @transform_3(%arg0: i32) -> (i32, i32) {
    %c0_i32 = arith.constant 0 : i32
    %c0_i32_0 = arith.constant 0 : i32
    return %c0_i32, %arg0 : i32, i32
  }
}

</mosaic_0001>

<bundles_post_ra>
// kernel: tpu_custom_call.1
= control target key start
LH: loop header
LB: loop body
LE: loop exit
PB: predicated region body
PF: predicated region fallthrough
CT: control target
= control target key end

     0   :  { %8 = vsyncpa [#allocation3], 0  ;;  %s220_s0 = inlined_call_operand.vmem [shape: f32[8,8], index: 0, kind: input, shape index: {}]   ;;  %s221_s1 = inlined_call_operand.hbm [shape: f32[8,128], index: 1, kind: input, shape index: {}]   ;;  %s222_s2 = inlined_call_operand.vmem [shape: f32[8,1], index: 2, kind: input, shape index: {}]   ;;  %s223_s3 = inlined_call_operand.hbm [shape: f32[8,128], index: 3, kind: output, shape index: {}]  }
   0x1   :  { %9 = vsyncpa [#allocation4], 0  ;;  %s183_s12 = smov [#allocation2]  }
   0x2   :  { %s18_s13 = sshll.u32 %s183_s12, 4  ;;  %s19_s13 = int_to_ptr.vmem [resolvable:$true] %s18_s13 }
   0x3   :  { %s147_s14 = scalar_lea.vmem %s19_s13, 128  ;;  %p152_p1 = scmp.lt.s32.totalorder %s19_s13, %s19_s13 }
   0x4   :  { %p148_p0 = scmp.ne.s32.totalorder %s19_s13, %s147_s14  ;;  %p153_p2 = scmp.lt.s32.totalorder %s147_s14, %s147_s14 }
   0x6   :  { %p154_p3 = por %p153_p2, %p152_p1 }
   0x8   :  { %p155_p4 = pnand %p154_p3, %p148_p0 }
   0xa   :  { %158 = shalt.err (!%p155_p4)
}
   0xb   :  { %21 = dma.hbm_to_vmem [thread:$0]  %s221_s1, 128, %s19_s13, [#allocation3]  }
   0xc   :  { %179 = dma.done.wait [#allocation3], 128  }
   0xd   :  { %180 = vsyncadd [#allocation3], 4294967168  ;;  %v184_v0 = vmov 0.0   ;;  %vm185_vm0 = vmmov 0   ;;  %v186_v1 = vmov 0   ;;  %vm35_vm1 = vcmask 64512  }
   0xe   :  { %128 = vmatprep.subr.mxu0 %v184_v0  ;;  %130 = vmatprep.mubr.msk.f32.mxu0 %vm185_vm0, %v184_v0  ;;  %v28_v2 = vld [vmem:[#allocation2] sm:$0xff]  ;;  %s187_s1 = smov [#allocation5]  }
   0xf   :  { %138 = vset.pattern.permute.xlu0 %v186_v1  ;;  %v27_v3 = vld [vmem:[%s220_s0] sm:$0xff]  ;;  %129 = vmatpush3.msra.mxu0 %v28_v2  ;;  %s116_s21 = sshll.u32 %s187_s1, 4  ;;  %s117_s21 = int_to_ptr.vmem [resolvable:$true] %s116_s21 }
  0x10   :  { %v29_v4 = vld [vmem:[%s222_s2] sm:$0xff]  ;;  %131 = vmatmul.mubr.msk.f32.vlgmr.msra.gmra.mxu0 %vm35_vm1, %v27_v3  ;;  %s159_s22 = scalar_lea.vmem %s117_s21, 128  ;;  %p164_p6 = scmp.lt.s32.totalorder %s117_s21, %s117_s21 }
  0x11   :  { %32 = vperm.xlu0 %138, %v29_v4   ;;  %p160_p5 = scmp.ne.s32.totalorder %s117_s21, %s159_s22  ;;  %p165_p7 = scmp.lt.s32.totalorder %s159_s22, %s159_s22 }
  0x13   :  { %p166_p8 = por %p165_p7, %p164_p6 }
  0x15   :  { %p167_p9 = pnand %p166_p8, %p160_p5 }
  0x8c   :  { %v33_v5 = vpop.permute.xlu0 %32 }
  0xd0   :  { %v105_v6 = vpop.f32.mrf.mxu0 }
  0xd1   :  { %v106_v7 = vadd.f32 %v105_v6, %v33_v5 }
  0xd2   :  { %v132_v8 = vpop.f32.mrf.mxu0 }
  0xd3   :  { %109 = vst [vmem:[#allocation5] sm:$0xff] %v106_v7 }
  0xd4   :  { %170 = shalt.err (!%p167_p9)
}
  0xd5   :  { %119 = dma.vmem_to_hbm [thread:$0]  %s117_s21, 128, %s223_s3, [#allocation4]  }
  0xd6   :  { %181 = dma.done.wait [#allocation4], 128  }
  0xd7   :  { %182 = vsyncadd [#allocation4], 4294967168 }
  0xd8   :  { %123 = vsyncpa [#allocation3], 1 }
  0xd9   :  { %124 = vsyncpa [#allocation4], 1 }

</bundles_post_ra>
